<compile_context>
chip_gen: v6e
topology: v6e:2x2x1
jax: 0.10.0
libtpu: 0.0.40
codegen_flags: <defaults>
</compile_context>

<pallas_src>
import functools

import jax
import jax.numpy as jnp
from jax.experimental import pallas as pl
from jax.experimental.pallas import tpu as pltpu


_LANES = 128      # vreg lane width (last dim)
_SUBLANES = 8     # vreg sublane width for f32 (second-to-last dim)


def _round_up(n, m):
    return ((n + m - 1) // m) * m


def _fused_posmlp_kernel(n_layers, x_ref, *refs):
    """Entire PosMLP in one kernel invocation.

    refs = (w1, b1, w2, b2, ..., wn, bn, o_ref); weights are pre-transposed to
    (in, out) and zero-padded to lane-dense shapes, biases are (1, out).
    Intermediate activations stay in VMEM/vregs.
    """
    o_ref = refs[-1]
    h = x_ref[...]
    for layer in range(n_layers):
        w = refs[2 * layer][...]
        b = refs[2 * layer + 1][...]
        # PosLinear weight transform 2*relu(-W)+W == |W|  (single VPU op).
        h = jnp.dot(h, jnp.abs(w), preferred_element_type=jnp.float32) + b
        if layer != n_layers - 1:
            h = jnp.maximum(h, 0.0)   # ReLU; Dropout(0.0) / use_bn=False are no-ops
    o_ref[...] = h.astype(o_ref.dtype)


def _prepare_padded_params(params):
    """PyTorch layout (W: (out,in), b: (out,)) -> (Wt: (in_pad, out_pad), b: (1, out_pad)).

    Pre-transposed so the kernel contracts along sublanes with lane-major outputs,
    zero-padded to multiples of 128 so every store/matmul is lane-dense. Padding is
    exact: padded weight columns/rows and biases are 0, and abs(0)=0, relu(0)=0.
    """
    padded = []
    for w, b in params:
        out_dim, in_dim = w.shape
        in_p = _round_up(in_dim, _LANES)
        out_p = _round_up(out_dim, _LANES)
        wt = jnp.zeros((in_p, out_p), jnp.float32).at[:in_dim, :out_dim].set(w.T)
        bp = jnp.zeros((1, out_p), jnp.float32).at[0, :out_dim].set(b)
        padded.append((wt, bp))
    return padded


def pos_mlp_forward(x, params, *, block_batch=256):
    """PosMLP forward as a single fused pallas_call.

    x: (batch, input_dim) f32; params: list of (W (out,in), b (out,)).
    Small batches -> one whole-array VMEM invocation (no grid, no pipeline
    bookkeeping). Large batches -> row-tiled grid with resident weights and
    "parallel" semantics so megacore TPUs (v7x) shard row blocks across cores.
    """
    batch, in_dim = x.shape
    n_layers = len(params)
    out_dim = params[-1][0].shape[0]

    padded_params = _prepare_padded_params(params)
    in_p = padded_params[0][0].shape[0]
    out_p = padded_params[-1][0].shape[1]

    kernel = functools.partial(_fused_posmlp_kernel, n_layers)
    flat_params = [a for wb in padded_params for a in wb]

    b8 = _round_up(batch, _SUBLANES)
    if b8 <= block_batch:
        # Single-block path: whole arrays resident in VMEM, one lane-dense store.
        x_pad = jnp.zeros((b8, in_p), jnp.float32).at[:batch, :in_dim].set(x)
        out_pad = pl.pallas_call(
            kernel,
            out_shape=jax.ShapeDtypeStruct((b8, out_p), jnp.float32),
        )(x_pad, *flat_params)
    else:
        # Batch-tiled path: stream row blocks, keep weights/biases resident
        # (constant index_map). Each block is a multiple of (8, 128).
        bp = _round_up(batch, block_batch)
        x_pad = jnp.zeros((bp, in_p), jnp.float32).at[:batch, :in_dim].set(x)
        in_specs = [pl.BlockSpec((block_batch, in_p), lambda i: (i, 0))]
        for w, b in padded_params:
            in_specs.append(pl.BlockSpec(w.shape, lambda i: (0, 0)))
            in_specs.append(pl.BlockSpec(b.shape, lambda i: (0, 0)))
        out_pad = pl.pallas_call(
            kernel,
            out_shape=jax.ShapeDtypeStruct((bp, out_p), jnp.float32),
            grid=(bp // block_batch,),
            in_specs=in_specs,
            out_specs=pl.BlockSpec((block_batch, out_p), lambda i: (i, 0)),
            compiler_params=pltpu.CompilerParams(
                dimension_semantics=("parallel",)),
        )(x_pad, *flat_params)

    return out_pad[:batch, :out_dim]


def init_params(key, dims_list):
    """Deterministic PyTorch-nn.Linear-style init: U(-1/sqrt(fan_in), 1/sqrt(fan_in))."""
    params = []
    for i in range(len(dims_list) - 1):
        fan_in, fan_out = dims_list[i], dims_list[i + 1]
        key, kw, kb = jax.random.split(key, 3)
        bound = 1.0 / (fan_in ** 0.5)
        w = jax.random.uniform(kw, (fan_out, fan_in), jnp.float32, -bound, bound)
        b = jax.random.uniform(kb, (fan_out,), jnp.float32, -bound, bound)
        params.append((w, b))
    return params


def reference_forward(x, params):
    """Pure-JAX reference (original unpadded PyTorch semantics)."""
    tmp = x
    n_layers = len(params)
    for i, (w, b) in enumerate(params):
        w_pos = 2.0 * jnp.maximum(-w, 0.0) + w
        tmp = tmp @ w_pos.T + b
        if i != n_layers - 1:
            tmp = jnp.maximum(tmp, 0.0)
    return tmp


if __name__ == "__main__":
    # PosMLP(input_dim=32, output_dim=16, dnn_units=[64, 32], activation='relu',
    #        dropout_rate=0.0, use_bn=False)
    input_dim, output_dim = 32, 16
    dnn_units = [64, 32]
    dims_list = [input_dim] + dnn_units + [output_dim]

    key = jax.random.PRNGKey(0)
    key, kx = jax.random.split(key)
    params = init_params(key, dims_list)

    # --- small-batch path (single fused VMEM block, no grid) ---
    batch = 8
    x = jax.random.normal(kx, (batch, input_dim), jnp.float32)
    out = jax.block_until_ready(pos_mlp_forward(x, params))
    ref = reference_forward(x, params)
    assert out.shape == (batch, output_dim)
    assert jnp.allclose(out, ref, atol=1e-4, rtol=1e-4), "small-batch mismatch"

    # --- batch-tiled path (grid over row blocks, weights resident) ---
    key, kx2 = jax.random.split(key)
    big_batch = 300
    x_big = jax.random.normal(kx2, (big_batch, input_dim), jnp.float32)
    out_big = jax.block_until_ready(
        pos_mlp_forward(x_big, params, block_batch=128))
    ref_big = reference_forward(x_big, params)
    assert out_big.shape == (big_batch, output_dim)
    assert jnp.allclose(out_big, ref_big, atol=1e-4, rtol=1e-4), "tiled mismatch"

    print("KERNEL_OK")
</pallas_src>

<mosaic_0001>
module attributes {stable_mosaic.version = 11 : i64} {
  func.func @_fused_posmlp_kernel(%arg0: memref<8x128xf32, #tpu.memory_space<vmem>>, %arg1: memref<128x128xf32, #tpu.memory_space<vmem>>, %arg2: memref<1x128xf32, #tpu.memory_space<vmem>>, %arg3: memref<128x128xf32, #tpu.memory_space<vmem>>, %arg4: memref<1x128xf32, #tpu.memory_space<vmem>>, %arg5: memref<128x128xf32, #tpu.memory_space<vmem>>, %arg6: memref<1x128xf32, #tpu.memory_space<vmem>>, %arg7: memref<8x128xf32, #tpu.memory_space<vmem>>) attributes {dimension_semantics = [], scalar_prefetch = 0 : i64, scratch_operands = 0 : i64, tpu.core_type = #tpu.core_type<tc>} {
    %c0 = arith.constant 0 : index
    %c0_0 = arith.constant 0 : index
    %0 = vector.load %arg0[%c0, %c0_0] : memref<8x128xf32, #tpu.memory_space<vmem>>, vector<8x128xf32>
    %c0_1 = arith.constant 0 : index
    %c0_2 = arith.constant 0 : index
    %1 = vector.load %arg1[%c0_1, %c0_2] : memref<128x128xf32, #tpu.memory_space<vmem>>, vector<128x128xf32>
    %c0_3 = arith.constant 0 : index
    %c0_4 = arith.constant 0 : index
    %2 = vector.load %arg2[%c0_3, %c0_4] : memref<1x128xf32, #tpu.memory_space<vmem>>, vector<1x128xf32>
    %3 = math.absf %1 : vector<128x128xf32>
    %cst = arith.constant dense<0.000000e+00> : vector<8x128xf32>
    %4 = tpu.matmul %0, %3, %cst {dimension_numbers = #tpu.dot_dimension_numbers<[1], [0], [0], [1], [0, 0, 1, 1], [], []>} : vector<8x128xf32>, vector<128x128xf32>, vector<8x128xf32> -> vector<8x128xf32>
    %5 = vector.broadcast %2 : vector<1x128xf32> to vector<8x128xf32>
    %6 = arith.addf %4, %5 : vector<8x128xf32>
    %cst_5 = arith.constant 0.000000e+00 : f32
    %7 = vector.broadcast %cst_5 : f32 to vector<8x128xf32>
    %8 = arith.maximumf %6, %7 : vector<8x128xf32>
    %c0_6 = arith.constant 0 : index
    %c0_7 = arith.constant 0 : index
    %9 = vector.load %arg3[%c0_6, %c0_7] : memref<128x128xf32, #tpu.memory_space<vmem>>, vector<128x128xf32>
    %c0_8 = arith.constant 0 : index
    %c0_9 = arith.constant 0 : index
    %10 = vector.load %arg4[%c0_8, %c0_9] : memref<1x128xf32, #tpu.memory_space<vmem>>, vector<1x128xf32>
    %11 = math.absf %9 : vector<128x128xf32>
    %cst_10 = arith.constant dense<0.000000e+00> : vector<8x128xf32>
    %12 = tpu.matmul %8, %11, %cst_10 {dimension_numbers = #tpu.dot_dimension_numbers<[1], [0], [0], [1], [0, 0, 1, 1], [], []>} : vector<8x128xf32>, vector<128x128xf32>, vector<8x128xf32> -> vector<8x128xf32>
    %13 = vector.broadcast %10 : vector<1x128xf32> to vector<8x128xf32>
    %14 = arith.addf %12, %13 : vector<8x128xf32>
    %cst_11 = arith.constant 0.000000e+00 : f32
    %15 = vector.broadcast %cst_11 : f32 to vector<8x128xf32>
    %16 = arith.maximumf %14, %15 : vector<8x128xf32>
    %c0_12 = arith.constant 0 : index
    %c0_13 = arith.constant 0 : index
    %17 = vector.load %arg5[%c0_12, %c0_13] : memref<128x128xf32, #tpu.memory_space<vmem>>, vector<128x128xf32>
    %c0_14 = arith.constant 0 : index
    %c0_15 = arith.constant 0 : index
    %18 = vector.load %arg6[%c0_14, %c0_15] : memref<1x128xf32, #tpu.memory_space<vmem>>, vector<1x128xf32>
    %19 = math.absf %17 : vector<128x128xf32>
    %cst_16 = arith.constant dense<0.000000e+00> : vector<8x128xf32>
    %20 = tpu.matmul %16, %19, %cst_16 {dimension_numbers = #tpu.dot_dimension_numbers<[1], [0], [0], [1], [0, 0, 1, 1], [], []>} : vector<8x128xf32>, vector<128x128xf32>, vector<8x128xf32> -> vector<8x128xf32>
    %21 = vector.broadcast %18 : vector<1x128xf32> to vector<8x128xf32>
    %22 = arith.addf %20, %21 : vector<8x128xf32>
    %c0_17 = arith.constant 0 : index
    %c0_18 = arith.constant 0 : index
    %23 = vector.load %arg7[%c0_17, %c0_18] : memref<8x128xf32, #tpu.memory_space<vmem>>, vector<8x128xf32>
    tpu.vector_store %arg7[%c0_17, %c0_18], %22 {strides = array<i32>} : memref<8x128xf32, #tpu.memory_space<vmem>>, vector<8x128xf32>,
    return
  }
}

</mosaic_0001>

<bundles_post_ra>
// kernel: tpu_custom_call.1
= control target key start
LH: loop header
LB: loop body
LE: loop exit
PB: predicated region body
PF: predicated region fallthrough
CT: control target
= control target key end

     0   :  { %12 = vsyncpa [#allocation3], 0  ;;  %s840_s0 = inlined_call_operand.hbm [shape: f32[8,128], index: 0, kind: input, shape index: {}]   ;;  %s841_s1 = inlined_call_operand.hbm [shape: f32[128,128], index: 1, kind: input, shape index: {}]   ;;  %s842_s2 = inlined_call_operand.vmem [shape: f32[1,128], index: 2, kind: input, shape index: {}]   ;;  %s843_s3 = inlined_call_operand.hbm [shape: f32[128,128], index: 3, kind: input, shape index: {}]   ;;  %s844_s4 = inlined_call_operand.vmem [shape: f32[1,128], index: 4, kind: input, shape index: {}]   ;;  %s845_s5 = inlined_call_operand.hbm [shape: f32[128,128], index: 5, kind: input, shape index: {}]   ;;  %s846_s6 = inlined_call_operand.vmem [shape: f32[1,128], index: 6, kind: input, shape index: {}]   ;;  %s847_s7 = inlined_call_operand.hbm [shape: f32[8,128], index: 7, kind: output, shape index: {}]  }
   0x1   :  { %13 = vsyncpa [#allocation6], 0 }
   0x2   :  { %14 = vsyncpa [#allocation9], 0 }
   0x3   :  { %15 = vsyncpa [#allocation4], 0  ;;  %s704_s24 = smov [#allocation5]  }
   0x4   :  { %s31_s25 = sshll.u32 %s704_s24, 4  ;;  %s32_s25 = int_to_ptr.vmem [resolvable:$true] %s31_s25 }
   0x5   :  { %s604_s26 = scalar_lea.vmem %s32_s25, 2048  ;;  %p609_p1 = scmp.lt.s32.totalorder %s32_s25, %s32_s25 }
   0x6   :  { %p605_p0 = scmp.ne.s32.totalorder %s32_s25, %s604_s26  ;;  %p610_p2 = scmp.lt.s32.totalorder %s604_s26, %s604_s26 }
   0x8   :  { %p611_p3 = por %p610_p2, %p609_p1 }
   0xa   :  { %p612_p4 = pnand %p611_p3, %p605_p0 }
   0xc   :  { %615 = shalt.err (!%p612_p4)
}
   0xd   :  { %s705_s27 = smov 128   ;;  %s706_s28 = smov 8  }
   0xe   :  { %37 = dma.hbm_to_vmem [thread:$0]  %s841_s1, 2048, %s32_s25, [#allocation6], %s705_s27, %s705_s27, %s706_s28  }
   0xf   :  { %s707_s8 = smov [#allocation2]   ;;  %s708_s10 = smov [#allocation7]  }
  0x10   :  { %s22_s9 = sshll.u32 %s707_s8, 4  ;;  %s45_s11 = sshll.u32 %s708_s10, 4  ;;  %s23_s9 = int_to_ptr.vmem [resolvable:$true] %s22_s9  ;;  %s46_s11 = int_to_ptr.vmem [resolvable:$true] %s45_s11 }
  0x11   :  { %s624_s12 = scalar_lea.vmem %s23_s9, 128  ;;  %p629_p6 = scmp.lt.s32.totalorder %s23_s9, %s23_s9 }
  0x12   :  { %p625_p5 = scmp.ne.s32.totalorder %s23_s9, %s624_s12  ;;  %p630_p7 = scmp.lt.s32.totalorder %s624_s12, %s624_s12 }
  0x14   :  { %p631_p8 = por %p630_p7, %p629_p6 }
  0x16   :  { %p632_p9 = pnand %p631_p8, %p625_p5 }
  0x18   :  { %635 = shalt.err (!%p632_p9)
}
  0x19   :  { %25 = dma.hbm_to_vmem [thread:$0]  %s840_s0, 128, %s23_s9, [#allocation3]  }
  0x1a   :  { %s644_s15 = scalar_lea.vmem %s46_s11, 2048  ;;  %p649_p11 = scmp.lt.s32.totalorder %s46_s11, %s46_s11 }
  0x1b   :  { %p645_p10 = scmp.ne.s32.totalorder %s46_s11, %s644_s15  ;;  %p650_p12 = scmp.lt.s32.totalorder %s644_s15, %s644_s15 }
  0x1d   :  { %p651_p13 = por %p650_p12, %p649_p11 }
  0x1f   :  { %p652_p0 = pnand %p651_p13, %p645_p10 }
  0x21   :  { %655 = shalt.err (!%p652_p0)
}
  0x22   :  { %51 = dma.hbm_to_vmem [thread:$0]  %s843_s3, 2048, %s46_s11, [#allocation6], %s705_s27, %s705_s27, %s706_s28  }
  0x23   :  { %s709_s17 = smov [#allocation8]  }
  0x24   :  { %s59_s18 = sshll.u32 %s709_s17, 4  ;;  %s60_s18 = int_to_ptr.vmem [resolvable:$true] %s59_s18 }
  0x25   :  { %s664_s19 = scalar_lea.vmem %s60_s18, 2048  ;;  %p669_p2 = scmp.lt.s32.totalorder %s60_s18, %s60_s18 }
  0x26   :  { %p665_p1 = scmp.ne.s32.totalorder %s60_s18, %s664_s19  ;;  %p670_p3 = scmp.lt.s32.totalorder %s664_s19, %s664_s19 }
  0x28   :  { %p671_p4 = por %p670_p3, %p669_p2 }
  0x2a   :  { %p672_p5 = pnand %p671_p4, %p665_p1 }
  0x2c   :  { %675 = shalt.err (!%p672_p5)
}
  0x2d   :  { %65 = dma.hbm_to_vmem [thread:$0]  %s845_s5, 2048, %s60_s18, [#allocation9], %s705_s27, %s705_s27, %s706_s28  }
  0x2e   :  { %696 = dma.done.wait [#allocation3], 128  }
  0x2f   :  { %697 = vsyncadd [#allocation3], 4294967168 }
  0x30   :  { %698 = dma.done.wait [#allocation6], 4096  }
  0x31   :  { %699 = vsyncadd [#allocation6], 4294963200 }
  0x32   :  { %700 = dma.done.wait [#allocation9], 2048  }
  0x33   :  { %701 = vsyncadd [#allocation9], 4294965248  ;;  %v710_v0 = vmov 0.0   ;;  %vm711_vm0 = vmmov 0   ;;  %v96_v1 = vld [vmem:[#allocation5 + $0x78] sm:$0xff]  ;;  %v95_v2 = vld [vmem:[#allocation5 + $0x70] sm:$0xff] }
  0x34   :  { %482 = vmatprep.subr.mxu0 %v710_v0  ;;  %514 = vmatprep.mubr.msk.f32.mxu0 %vm711_vm0, %v710_v0  ;;  %v94_v3 = vld [vmem:[#allocation5 + $0x68] sm:$0xff]  ;;  %v113_v4 = vand.u32 2147483647, %v96_v1  ;;  %v112_v5 = vand.u32 2147483647, %v95_v2  ;;  %v93_v6 = vld [vmem:[#allocation5 + $0x60] sm:$0xff] }
  0x35   :  { %517 = vmatprep.subr.mxu1 %v710_v0  ;;  %549 = vmatprep.mubr.msk.f32.mxu1 %vm711_vm0, %v710_v0  ;;  %v111_v7 = vand.u32 2147483647, %v94_v3  ;;  %v92_v8 = vld [vmem:[#allocation5 + $0x58] sm:$0xff]  ;;  %v110_v9 = vand.u32 2147483647, %v93_v6  ;;  %v91_v10 = vld [vmem:[#allocation5 + $0x50] sm:$0xff] }
  0x36   :  { %483 = vmatpush3.msra.mxu0 %v113_v4  ;;  %v109_v11 = vand.u32 2147483647, %v92_v8  ;;  %v90_v12 = vld [vmem:[#allocation5 + $0x48] sm:$0xff]  ;;  %v108_v13 = vand.u32 2147483647, %v91_v10  ;;  %v89_v14 = vld [vmem:[#allocation5 + $0x40] sm:$0xff] }
  0x37   :  { %484 = vmatprep.subr.mxu0 %v710_v0  ;;  %v206_v15 = vld [vmem:[#allocation7 + $0x78] sm:$0xff]  ;;  %v107_v16 = vand.u32 2147483647, %v90_v12  ;;  %v205_v18 = vld [vmem:[#allocation7 + $0x70] sm:$0xff]  ;;  %v204_v19 = vld [vmem:[#allocation7 + $0x68] sm:$0xff]  ;;  %s712_s24 = smov [#allocation10]  }
  0x38   :  { %485 = vmatpush3.msra.mxu0 %v112_v5  ;;  %v223_v17 = vand.u32 2147483647, %v206_v15  ;;  %v88_v20 = vld [vmem:[#allocation5 + $0x38] sm:$0xff]  ;;  %v222_v21 = vand.u32 2147483647, %v205_v18  ;;  %v203_v22 = vld [vmem:[#allocation7 + $0x60] sm:$0xff] }
  0x39   :  { %486 = vmatprep.subr.mxu0 %v710_v0  ;;  %v106_v23 = vand.u32 2147483647, %v89_v14  ;;  %v221_v24 = vand.u32 2147483647, %v204_v19  ;;  %v87_v25 = vld [vmem:[#allocation5 + $0x30] sm:$0xff]  ;;  %v202_v26 = vld [vmem:[#allocation7 + $0x58] sm:$0xff] }
  0x3a   :  { %487 = vmatpush3.msra.mxu0 %v111_v7  ;;  %518 = vmatpush3.msra.mxu1 %v223_v17  ;;  %v105_v27 = vand.u32 2147483647, %v88_v20  ;;  %v220_v28 = vand.u32 2147483647, %v203_v22  ;;  %v86_v29 = vld [vmem:[#allocation5 + $0x28] sm:$0xff]  ;;  %v201_v30 = vld [vmem:[#allocation7 + $0x50] sm:$0xff] }
  0x3b   :  { %488 = vmatprep.subr.mxu0 %v710_v0  ;;  %519 = vmatprep.subr.mxu1 %v710_v0  ;;  %v104_v31 = vand.u32 2147483647, %v87_v25  ;;  %v219_v32 = vand.u32 2147483647, %v202_v26  ;;  %v85_v33 = vld [vmem:[#allocation5 + $0x20] sm:$0xff]  ;;  %v200_v34 = vld [vmem:[#allocation7 + $0x48] sm:$0xff] }
  0x3c   :  { %489 = vmatpush3.msra.mxu0 %v110_v9  ;;  %520 = vmatpush3.msra.mxu1 %v222_v21  ;;  %v103_v35 = vand.u32 2147483647, %v86_v29  ;;  %v218_v36 = vand.u32 2147483647, %v201_v30  ;;  %v84_v37 = vld [vmem:[#allocation5 + $0x18] sm:$0xff]  ;;  %v199_v38 = vld [vmem:[#allocation7 + $0x40] sm:$0xff] }
  0x3d   :  { %490 = vmatprep.subr.mxu0 %v710_v0  ;;  %521 = vmatprep.subr.mxu1 %v710_v0  ;;  %v102_v39 = vand.u32 2147483647, %v85_v33  ;;  %v217_v40 = vand.u32 2147483647, %v200_v34  ;;  %v83_v41 = vld [vmem:[#allocation5 + $0x10] sm:$0xff]  ;;  %v198_v42 = vld [vmem:[#allocation7 + $0x38] sm:$0xff] }
  0x3e   :  { %491 = vmatpush3.msra.mxu0 %v109_v11  ;;  %522 = vmatpush3.msra.mxu1 %v221_v24  ;;  %v101_v43 = vand.u32 2147483647, %v84_v37  ;;  %v216_v44 = vand.u32 2147483647, %v199_v38  ;;  %v82_v45 = vld [vmem:[#allocation5 + $0x8] sm:$0xff]  ;;  %v197_v46 = vld [vmem:[#allocation7 + $0x30] sm:$0xff] }
  0x3f   :  { %492 = vmatprep.subr.mxu0 %v710_v0  ;;  %523 = vmatprep.subr.mxu1 %v710_v0  ;;  %v100_v47 = vand.u32 2147483647, %v83_v41  ;;  %v215_v48 = vand.u32 2147483647, %v198_v42  ;;  %v81_v49 = vld [vmem:[#allocation5] sm:$0xff]  ;;  %v196_v50 = vld [vmem:[#allocation7 + $0x28] sm:$0xff] }
  0x40   :  { %493 = vmatpush3.msra.mxu0 %v108_v13  ;;  %524 = vmatpush3.msra.mxu1 %v220_v28  ;;  %v99_v51 = vand.u32 2147483647, %v82_v45  ;;  %v214_v52 = vand.u32 2147483647, %v197_v46  ;;  %v195_v53 = vld [vmem:[#allocation7 + $0x20] sm:$0xff]  ;;  %v194_v56 = vld [vmem:[#allocation7 + $0x18] sm:$0xff] }
  0x41   :  { %494 = vmatprep.subr.mxu0 %v710_v0  ;;  %525 = vmatprep.subr.mxu1 %v710_v0  ;;  %v98_v54 = vand.u32 2147483647, %v81_v49  ;;  %v213_v55 = vand.u32 2147483647, %v196_v50  ;;  %v80_v57 = vld [vmem:[#allocation2] sm:$0xff]  ;;  %v193_v60 = vld [vmem:[#allocation7 + $0x10] sm:$0xff] }
  0x42   :  { %495 = vmatpush3.msra.mxu0 %v107_v16  ;;  %526 = vmatpush3.msra.mxu1 %v219_v32  ;;  %v212_v58 = vand.u32 2147483647, %v195_v53  ;;  %v211_v59 = vand.u32 2147483647, %v194_v56  ;;  %v210_v61 = vand.u32 2147483647, %v193_v60 }
  0x43   :  { %496 = vmatprep.subr.mxu0 %v710_v0  ;;  %527 = vmatprep.subr.mxu1 %v710_v0  ;;  %v192_v62 = vld [vmem:[#allocation7 + $0x8] sm:$0xff]  ;;  %v191_v1 = vld [vmem:[#allocation7] sm:$0xff]  ;;  %v316_v3 = vld [vmem:[#allocation8 + $0x78] sm:$0xff]  ;;  %s417_s25 = sshll.u32 %s712_s24, 4  ;;  %s418_s25 = int_to_ptr.vmem [resolvable:$true] %s417_s25 }
  0x44   :  { %497 = vmatpush3.msra.mxu0 %v106_v23  ;;  %528 = vmatpush3.msra.mxu1 %v218_v36  ;;  %v209_v63 = vand.u32 2147483647, %v192_v62  ;;  %v208_v2 = vand.u32 2147483647, %v191_v1  ;;  %v315_v4 = vld [vmem:[#allocation8 + $0x70] sm:$0xff]  ;;  %v314_v5 = vld [vmem:[#allocation8 + $0x68] sm:$0xff]  ;;  %p681_p7 = scmp.lt.s32.totalorder %s418_s25, %s418_s25 }
  0x45   :  { %498 = vmatprep.subr.mxu0 %v710_v0  ;;  %529 = vmatprep.subr.mxu1 %v710_v0  ;;  %v333_v6 = vand.u32 2147483647, %v316_v3  ;;  %v332_v7 = vand.u32 2147483647, %v315_v4  ;;  %v313_v8 = vld [vmem:[#allocation8 + $0x60] sm:$0xff]  ;;  %v312_v10 = vld [vmem:[#allocation8 + $0x58] sm:$0xff] }
  0x46   :  { %499 = vmatpush3.msra.mxu0 %v105_v27  ;;  %530 = vmatpush3.msra.mxu1 %v217_v40  ;;  %v331_v9 = vand.u32 2147483647, %v314_v5  ;;  %v330_v11 = vand.u32 2147483647, %v313_v8  ;;  %v311_v12 = vld [vmem:[#allocation8 + $0x50] sm:$0xff]  ;;  %v310_v14 = vld [vmem:[#allocation8 + $0x48] sm:$0xff] }
  0x47   :  { %500 = vmatprep.subr.mxu0 %v710_v0  ;;  %531 = vmatprep.subr.mxu1 %v710_v0  ;;  %v329_v13 = vand.u32 2147483647, %v312_v10  ;;  %v328_v15 = vand.u32 2147483647, %v311_v12  ;;  %v309_v16 = vld [vmem:[#allocation8 + $0x40] sm:$0xff]  ;;  %v308_v18 = vld [vmem:[#allocation8 + $0x38] sm:$0xff] }
  0x48   :  { %501 = vmatpush3.msra.mxu0 %v104_v31  ;;  %532 = vmatpush3.msra.mxu1 %v216_v44  ;;  %v327_v17 = vand.u32 2147483647, %v310_v14  ;;  %v326_v19 = vand.u32 2147483647, %v309_v16  ;;  %v307_v20 = vld [vmem:[#allocation8 + $0x30] sm:$0xff]  ;;  %v306_v22 = vld [vmem:[#allocation8 + $0x28] sm:$0xff] }
  0x49   :  { %502 = vmatprep.subr.mxu0 %v710_v0  ;;  %533 = vmatprep.subr.mxu1 %v710_v0  ;;  %v325_v21 = vand.u32 2147483647, %v308_v18  ;;  %v324_v23 = vand.u32 2147483647, %v307_v20  ;;  %v305_v24 = vld [vmem:[#allocation8 + $0x20] sm:$0xff]  ;;  %v304_v26 = vld [vmem:[#allocation8 + $0x18] sm:$0xff] }
  0x4a   :  { %503 = vmatpush3.msra.mxu0 %v103_v35  ;;  %534 = vmatpush3.msra.mxu1 %v215_v48  ;;  %v323_v25 = vand.u32 2147483647, %v306_v22  ;;  %v322_v27 = vand.u32 2147483647, %v305_v24  ;;  %v321_v28 = vand.u32 2147483647, %v304_v26 }
  0x4b   :  { %504 = vmatprep.subr.mxu0 %v710_v0  ;;  %535 = vmatprep.subr.mxu1 %v710_v0  ;;  %v428_v29 = vld [vmem:[%s842_s2] ss:$0 sm:$0xff]  ;;  %v303_v34 = vld [vmem:[#allocation8 + $0x10] sm:$0xff]  ;;  %v302_v36 = vld [vmem:[#allocation8 + $0x8] sm:$0xff]  ;;  %s676_s26 = scalar_lea.vmem %s418_s25, 128 }
  0x4c   :  { %505 = vmatpush3.msra.mxu0 %v102_v39  ;;  %536 = vmatpush3.msra.mxu1 %v214_v52  ;;  %v320_v35 = vand.u32 2147483647, %v303_v34  ;;  %v319_v37 = vand.u32 2147483647, %v302_v36  ;;  %v301_v38 = vld [vmem:[#allocation8] sm:$0xff]  ;;  %p677_p6 = scmp.ne.s32.totalorder %s418_s25, %s676_s26  ;;  %p682_p8 = scmp.lt.s32.totalorder %s676_s26, %s676_s26 }
  0x4d   :  { %506 = vmatprep.subr.mxu0 %v710_v0  ;;  %537 = vmatprep.subr.mxu1 %v710_v0  ;;  %v318_v39 = vand.u32 2147483647, %v301_v38  ;;  %v429_v40 = vld [vmem:[%s844_s4] ss:$0 sm:$0xff] }
  0x4e   :  { %507 = vmatpush3.msra.mxu0 %v101_v43  ;;  %538 = vmatpush3.msra.mxu1 %v213_v55  ;;  %v430_v45 = vld [vmem:[%s846_s6] ss:$0 sm:$0xff]  ;;  %p683_p9 = por %p682_p8, %p681_p7 }
  0x4f   :  { %508 = vmatprep.subr.mxu0 %v710_v0  ;;  %539 = vmatprep.subr.mxu1 %v710_v0 }
  0x50   :  { %509 = vmatpush3.msra.mxu0 %v100_v47  ;;  %540 = vmatpush3.msra.mxu1 %v212_v58  ;;  %p684_p10 = pnand %p683_p9, %p677_p6 }
  0x51   :  { %510 = vmatprep.subr.mxu0 %v710_v0  ;;  %541 = vmatprep.subr.mxu1 %v710_v0 }
  0x52   :  { %511 = vmatpush3.msra.mxu0 %v99_v51  ;;  %542 = vmatpush3.msra.mxu1 %v211_v59 }
  0x53   :  { %512 = vmatprep.subr.mxu0 %v710_v0  ;;  %543 = vmatprep.subr.mxu1 %v710_v0 }
  0x54   :  { %513 = vmatpush3.msra.mxu0 %v98_v54  ;;  %544 = vmatpush3.msra.mxu1 %v210_v61 }
  0x55   :  { %515 = vmatmul.mubr.f32.vlgmr.msra.gmra.mxu0 %v80_v57  ;;  %552 = vmatprep.subr.mxu0 %v710_v0 }
  0x56   :  { %584 = vmatprep.mubr.msk.f32.mxu0 %vm711_vm0, %v710_v0  ;;  %545 = vmatprep.subr.mxu1 %v710_v0 }
  0x57   :  { %546 = vmatpush3.msra.mxu1 %v209_v63  ;;  %553 = vmatpush3.msra.mxu0 %v333_v6 }
  0x58   :  { %547 = vmatprep.subr.mxu1 %v710_v0  ;;  %554 = vmatprep.subr.mxu0 %v710_v0 }
  0x59   :  { %548 = vmatpush3.msra.mxu1 %v208_v2  ;;  %555 = vmatpush3.msra.mxu0 %v332_v7 }
  0x5a   :  { %556 = vmatprep.subr.mxu0 %v710_v0 }
  0x5b   :  { %557 = vmatpush3.msra.mxu0 %v331_v9 }
  0x5c   :  { %558 = vmatprep.subr.mxu0 %v710_v0 }
  0x5d   :  { %559 = vmatpush3.msra.mxu0 %v330_v11 }
  0x5e   :  { %560 = vmatprep.subr.mxu0 %v710_v0 }
  0x5f   :  { %561 = vmatpush3.msra.mxu0 %v329_v13 }
  0x60   :  { %562 = vmatprep.subr.mxu0 %v710_v0 }
  0x61   :  { %563 = vmatpush3.msra.mxu0 %v328_v15 }
  0x62   :  { %564 = vmatprep.subr.mxu0 %v710_v0 }
  0x63   :  { %565 = vmatpush3.msra.mxu0 %v327_v17 }
  0x64   :  { %566 = vmatprep.subr.mxu0 %v710_v0 }
  0x65   :  { %567 = vmatpush3.msra.mxu0 %v326_v19 }
  0x66   :  { %568 = vmatprep.subr.mxu0 %v710_v0 }
  0x67   :  { %569 = vmatpush3.msra.mxu0 %v325_v21 }
  0x68   :  { %570 = vmatprep.subr.mxu0 %v710_v0 }
  0x69   :  { %571 = vmatpush3.msra.mxu0 %v324_v23 }
  0x6a   :  { %572 = vmatprep.subr.mxu0 %v710_v0 }
  0x6b   :  { %573 = vmatpush3.msra.mxu0 %v323_v25 }
  0x6c   :  { %574 = vmatprep.subr.mxu0 %v710_v0 }
  0x6d   :  { %575 = vmatpush3.msra.mxu0 %v322_v27 }
  0x6e   :  { %576 = vmatprep.subr.mxu0 %v710_v0 }
  0x6f   :  { %577 = vmatpush3.msra.mxu0 %v321_v28 }
  0x70   :  { %578 = vmatprep.subr.mxu0 %v710_v0 }
  0x71   :  { %579 = vmatpush3.msra.mxu0 %v320_v35 }
  0x72   :  { %580 = vmatprep.subr.mxu0 %v710_v0 }
  0x73   :  { %581 = vmatpush3.msra.mxu0 %v319_v37 }
  0x74   :  { %582 = vmatprep.subr.mxu0 %v710_v0 }
  0x75   :  { %583 = vmatpush3.msra.mxu0 %v318_v39 }
 0x115   :  { %v186_v30 = vpop.f32.mrf.mxu0 }
 0x116   :  { %v187_v31 = vadd.f32 %v428_v29, %v186_v30 }
 0x117   :  { %v516_v32 = vpop.f32.mrf.mxu0 }
 0x118   :  { %v190_v33 = vmax.f32 %v187_v31, 0.0 }
 0x11a   :  { %550 = vmatmul.mubr.f32.vlgmr.msra.gmra.mxu1 %v190_v33 }
 0x1da   :  { %v296_v41 = vpop.f32.mrf.mxu1 }
 0x1db   :  { %v297_v42 = vadd.f32 %v429_v40, %v296_v41 }
 0x1dc   :  { %v551_v43 = vpop.f32.mrf.mxu1 }
 0x1dd   :  { %v300_v44 = vmax.f32 %v297_v42, 0.0 }
 0x1df   :  { %585 = vmatmul.mubr.f32.vlgmr.msra.gmra.mxu0 %v300_v44 }
 0x29f   :  { %v406_v46 = vpop.f32.mrf.mxu0 }
 0x2a0   :  { %v407_v47 = vadd.f32 %v430_v45, %v406_v46 }
 0x2a1   :  { %v586_v0 = vpop.f32.mrf.mxu0 }
 0x2a2   :  { %410 = vst [vmem:[#allocation10] sm:$0xff] %v407_v47 }
 0x2a3   :  { %687 = shalt.err (!%p684_p10)
}
 0x2a4   :  { %420 = dma.vmem_to_hbm [thread:$0]  %s418_s25, 128, %s847_s7, [#allocation4]  }
 0x2a5   :  { %702 = dma.done.wait [#allocation4], 128  }
 0x2a6   :  { %703 = vsyncadd [#allocation4], 4294967168 }
 0x2a7   :  { %424 = vsyncpa [#allocation3], 1 }
 0x2a8   :  { %425 = vsyncpa [#allocation6], 1 }
 0x2a9   :  { %426 = vsyncpa [#allocation9], 1 }
 0x2aa   :  { %427 = vsyncpa [#allocation4], 1 }

</bundles_post_ra>
